<compile_context>
chip_gen: v7x
topology: tpu7x:2x2x1
jax: 0.10.0
libtpu: 0.0.40
codegen_flags: <defaults>
</compile_context>

<pallas_src>
import functools

import jax
import jax.numpy as jnp
from jax import lax
from jax.experimental import pallas as pl
from jax.experimental.pallas import tpu as pltpu

_LANE = 128
_PRED_PAD = -1e9  # sigmoid(-1e9) == 0 exactly -> padded positions add nothing


def _round_up(x, m):
    return (x + m - 1) // m * m


def _per_input_tile_bytes():
    """Per-input, per-pipeline-buffer tile budget in bytes.

    Each grid step carries ~0.35 us of fixed overhead, so tiles are sized per
    generation so the HBM DMA time dominates, while 2 inputs x 2 pipeline
    buffers + scratch stay comfortably inside scoped VMEM (v7x's physical
    VMEM per TensorCore is only 64 MiB).
    """
    try:
        kind = jax.devices()[0].device_kind.lower()
    except Exception:
        kind = ""
    if "v5 lite" in kind or "v5e" in kind or "v5lite" in kind:
        return 2 * 1024 * 1024     # ~5 us/step at ~0.8 TB/s: already amortized
    if "v2" in kind or "v3" in kind or "v4" in kind:
        return 2 * 1024 * 1024     # conservative for older parts
    if "v6" in kind:
        return 4 * 1024 * 1024     # ~3 us/step at ~1.4 TB/s
    return 6 * 1024 * 1024         # v7x / default: ~3.8 us/step at ~3.2 TB/s


def _pick_fold(s_pad, batch, itemsize, budget):
    """Pick the lane-dense fold width F (a multiple of 128 dividing s_pad)."""
    cands = [f for f in (512, 256, 128) if s_pad % f == 0]
    # Prefer an F giving >= 8 rows (full sublanes per batch element) whose
    # minimal 8-row tile still fits the per-input budget at this batch size.
    for f in cands:
        if s_pad // f >= 8 and batch * 8 * f * itemsize <= budget:
            return f
    for f in reversed(cands):        # smallest F first as a large-batch fallback
        if batch * 8 * f * itemsize <= budget:
            return f
    # TODO(synk): for extremely large batch sizes even the minimal 8-row tile
    # exceeds the budget; tile the batch axis as well instead of F = 128.
    return cands[-1]


def soft_iou_kernel(pred_ref, target_ref, out_ref, inter_acc, sum_acc,
                    *, tile_r, rows_total, tiles_per_core):
    """One grid step: accumulate per-batch, lane-wise partial sums."""
    i = pl.program_id(1)

    @pl.when(i == 0)
    def _init():
        inter_acc[...] = jnp.zeros_like(inter_acc)
        sum_acc[...] = jnp.zeros_like(sum_acc)

    # Rows of this block inside the real array.  Blocks past the end (cdiv
    # remainder / phantom tiles from the 2-way core split) re-fetch the last
    # real block via a clamped index_map and are masked out here.
    tile_idx = pl.program_id(0) * tiles_per_core + i
    valid_rows = rows_total - tile_idx * tile_r

    x = pred_ref[...].astype(jnp.float32)          # (B, tile_r, F)
    t = target_ref[...].astype(jnp.float32)        # (B, tile_r, F)
    # sigmoid(x) == 0.5 * tanh(0.5 * x) + 0.5 : one EUP transcendental/elem.
    p = 0.5 * jnp.tanh(0.5 * x) + 0.5

    @pl.when(valid_rows >= tile_r)                 # common case: no masking
    def _full():
        inter_acc[...] += jnp.sum(p * t, axis=1)   # (B, F) lane partials
        sum_acc[...] += jnp.sum(p + t, axis=1)

    @pl.when(valid_rows < tile_r)                  # ragged / phantom tile
    def _partial():
        row = lax.broadcasted_iota(jnp.int32, x.shape, 1)
        m = row < valid_rows
        inter_acc[...] += jnp.sum(jnp.where(m, p * t, 0.0), axis=1)
        sum_acc[...] += jnp.sum(jnp.where(m, p + t, 0.0), axis=1)

    @pl.when(i == pl.num_programs(1) - 1)
    def _finalize():
        # Lane-dense partial sums; the tiny cross-lane reduce, IoU ratio and
        # batch mean are done in plain JAX outside the kernel.
        out_ref[0, 0, :, :] = inter_acc[...]
        out_ref[0, 1, :, :] = sum_acc[...]


def soft_iou_loss(pred, target, smooth=1.0, tile_budget_bytes=None):
    assert pred.shape == target.shape
    assert pred.ndim == 3
    B, H, W = pred.shape
    S = H * W

    p_item = jnp.dtype(pred.dtype).itemsize
    t_item = jnp.dtype(target.dtype).itemsize
    itemsize = max(p_item, t_item)
    # Sublane granularity of the most packed input dtype (f32:8, bf16:16, ...).
    sub = 8 * max(1, 4 // min(p_item, t_item))
    budget = (_per_input_tile_bytes() if tile_budget_bytes is None
              else int(tile_budget_bytes))

    # Lane-dense flattening of the spatial axes (free reshape in XLA).  Keep
    # the input dtype (e.g. bf16) -- the kernel upcasts per tile.
    pred2 = pred.reshape(B, S)
    target2 = target.reshape(B, S)

    s_pad = _round_up(S, _LANE)
    if s_pad != S:
        # Only for spatial sizes that are not a multiple of 128: one small pad
        # so the lane-dense (B, R, F) view exists.  pred padded with a large
        # negative (sigmoid -> 0 exactly) and target with 0 => contributes 0.
        pad = s_pad - S
        pred2 = jnp.pad(pred2, ((0, 0), (0, pad)), constant_values=_PRED_PAD)
        target2 = jnp.pad(target2, ((0, 0), (0, pad)), constant_values=0.0)

    F = _pick_fold(s_pad, B, itemsize, budget)
    R = s_pad // F
    pred3 = pred2.reshape(B, R, F)
    target3 = target2.reshape(B, R, F)

    # Row-tile size: as many sublane-aligned rows as fit the per-input budget.
    rows_fit = max(1, budget // max(1, B * F * itemsize))
    if rows_fit >= R:
        tile_r = R                       # one block over the full row axis
    else:
        tile_r = max(sub, rows_fit // sub * sub)

    t_all = pl.cdiv(R, tile_r)           # number of real row tiles
    # 2-way split of the row tiles across TensorCores (v7x megacore); on
    # single-core chips the "parallel" axis just runs as two serial halves.
    n_split = 2 if t_all >= 2 else 1
    tiles_per_core = pl.cdiv(t_all, n_split)
    last_block = t_all - 1

    def in_map(c, i):
        # Clamp so phantom tiles (cdiv remainder / core split) fetch a real
        # block; their contribution is masked to zero inside the kernel.
        return (0, jnp.minimum(c * tiles_per_core + i, last_block), 0)

    kernel = functools.partial(
        soft_iou_kernel, tile_r=tile_r, rows_total=R,
        tiles_per_core=tiles_per_core)

    tile_bytes = B * tile_r * F * itemsize
    side_bytes = 4 * B * F * 4           # 2 scratch accumulators + out block
    vmem_limit = min(
        max(4 * tile_bytes + 2 * side_bytes + (2 << 20), 16 << 20),
        48 * 1024 * 1024)                # stays inside v7x's 64 MiB VMEM

    partials = pl.pallas_call(
        kernel,
        out_shape=jax.ShapeDtypeStruct((n_split, 2, B, F), jnp.float32),
        grid_spec=pltpu.PrefetchScalarGridSpec(
            num_scalar_prefetch=0,
            grid=(n_split, tiles_per_core),
            in_specs=[
                pl.BlockSpec((B, tile_r, F), in_map),
                pl.BlockSpec((B, tile_r, F), in_map),
            ],
            out_specs=pl.BlockSpec((1, 2, B, F), lambda c, i: (c, 0, 0, 0)),
            scratch_shapes=[
                pltpu.VMEM((B, F), jnp.float32),   # running inter, lane-wise
                pltpu.VMEM((B, F), jnp.float32),   # running sum(p) + sum(t)
            ],
        ),
        compiler_params=pltpu.CompilerParams(
            dimension_semantics=("parallel", "arbitrary"),
            vmem_limit_bytes=int(vmem_limit)),
        cost_estimate=pl.CostEstimate(
            flops=7 * B * s_pad,
            transcendentals=B * s_pad,
            bytes_accessed=B * s_pad * (p_item + t_item)
                           + n_split * 2 * B * F * 4),
    )(pred3, target3)

    # Tiny finalize in plain JAX: cross-core/lane reduce, IoU ratio, batch mean.
    inter = jnp.sum(partials[:, 0], axis=(0, 2))        # (B,)
    total = jnp.sum(partials[:, 1], axis=(0, 2))        # (B,)
    union = total - inter                               # sum(p)+sum(t)-inter
    iou = (inter + smooth) / (union + smooth)
    return 1.0 - jnp.mean(iou)


def soft_iou_loss_ref(pred, target, smooth=1.0):
    # Pure-JAX reference mirroring the PyTorch module.
    p = jax.nn.sigmoid(pred.astype(jnp.float32))
    t = target.astype(jnp.float32)
    inter = jnp.sum(p * t, axis=(1, 2))
    p_sum = jnp.sum(p, axis=(1, 2))
    t_sum = jnp.sum(t, axis=(1, 2))
    loss = (inter + smooth) / (p_sum + t_sum - inter + smooth)
    return 1.0 - jnp.mean(loss)


if __name__ == "__main__":
    key = jax.random.PRNGKey(0)
    k1, k2, k3, k4, k5, k6 = jax.random.split(key, 6)

    # Case 1: small lane-aligned spatial size (single tile, single core).
    B, H, W = 2, 16, 16
    pred = jax.random.normal(k1, (B, H, W), dtype=jnp.float32)
    target = (jax.random.uniform(k2, (B, H, W)) > 0.5).astype(jnp.float32)
    out = soft_iou_loss(pred, target, smooth=1.0)
    jax.block_until_ready(out)
    ref = soft_iou_loss_ref(pred, target, smooth=1.0)
    assert jnp.allclose(out, ref, atol=1e-5, rtol=1e-5), (out, ref)

    # Case 2: tiny forced tile budget -> multi-tile grid, 2-way core split,
    # ragged last tile (masked) and one fully-masked phantom tile.
    B, H, W = 2, 34, 64
    pred = jax.random.normal(k3, (B, H, W), dtype=jnp.float32)
    target = (jax.random.uniform(k4, (B, H, W)) > 0.5).astype(jnp.float32)
    out = soft_iou_loss(pred, target, smooth=1.0, tile_budget_bytes=8192)
    jax.block_until_ready(out)
    ref = soft_iou_loss_ref(pred, target, smooth=1.0)
    assert jnp.allclose(out, ref, atol=1e-5, rtol=1e-5), (out, ref)

    # Case 3: spatial size not a multiple of 128 -> lane-pad fallback path.
    B, H, W = 3, 10, 10
    pred = jax.random.normal(k5, (B, H, W), dtype=jnp.float32)
    target = (jax.random.uniform(k6, (B, H, W)) > 0.5).astype(jnp.float32)
    out = soft_iou_loss(pred, target, smooth=1.0)
    jax.block_until_ready(out)
    ref = soft_iou_loss_ref(pred, target, smooth=1.0)
    assert jnp.allclose(out, ref, atol=1e-5, rtol=1e-5), (out, ref)

    print("KERNEL_OK")
</pallas_src>

<mosaic_0001>
module attributes {stable_mosaic.version = 11 : i64} {
  func.func @soft_iou_kernel(%arg0: i32, %arg1: i32, %arg2: memref<2x2x128xf32, #tpu.memory_space<vmem>>, %arg3: memref<2x2x128xf32, #tpu.memory_space<vmem>>, %arg4: memref<1x2x2x128xf32, #tpu.memory_space<vmem>>, %arg5: memref<2x128xf32, #tpu.memory_space<vmem>>, %arg6: memref<2x128xf32, #tpu.memory_space<vmem>>) attributes {dimension_semantics = [#tpu.dimension_semantics<parallel>, #tpu.dimension_semantics<arbitrary>], iteration_bounds = array<i64: 1, 1>, scalar_prefetch = 0 : i64, scratch_operands = 2 : i64, tpu.core_type = #tpu.core_type<tc>, window_params = [{transform_indices = @transform_0, window_bounds = array<i64: 2, 2, 128>}, {transform_indices = @transform_1, window_bounds = array<i64: 2, 2, 128>}, {transform_indices = @transform_2, window_bounds = array<i64: 1, 2, 2, 128>}]} {
    %c0_i32 = arith.constant 0 : i32
    %0 = arith.cmpi eq, %arg1, %c0_i32 : i32
    %1 = arith.extui %0 : i1 to i32
    %c0_i32_0 = arith.constant 0 : i32
    %2 = arith.cmpi ne, %1, %c0_i32_0 : i32
    scf.if %2 {
      %cst_15 = arith.constant 0.000000e+00 : f32
      %25 = vector.broadcast %cst_15 : f32 to vector<2x128xf32>
      %c0_16 = arith.constant 0 : index
      %c0_17 = arith.constant 0 : index
      %26 = vector.load %arg5[%c0_16, %c0_17] : memref<2x128xf32, #tpu.memory_space<vmem>>, vector<2x128xf32>
      tpu.vector_store %arg5[%c0_16, %c0_17], %25 {strides = array<i32>} : memref<2x128xf32, #tpu.memory_space<vmem>>, vector<2x128xf32>,
      %cst_18 = arith.constant 0.000000e+00 : f32
      %27 = vector.broadcast %cst_18 : f32 to vector<2x128xf32>
      %c0_19 = arith.constant 0 : index
      %c0_20 = arith.constant 0 : index
      %28 = vector.load %arg6[%c0_19, %c0_20] : memref<2x128xf32, #tpu.memory_space<vmem>>, vector<2x128xf32>
      tpu.vector_store %arg6[%c0_19, %c0_20], %27 {strides = array<i32>} : memref<2x128xf32, #tpu.memory_space<vmem>>, vector<2x128xf32>,
    } else {
    }
    %c1_i32 = arith.constant 1 : i32
    %3 = arith.muli %arg0, %c1_i32 : i32
    %4 = arith.addi %3, %arg1 : i32
    %c2_i32 = arith.constant 2 : i32
    %5 = arith.muli %4, %c2_i32 : i32
    %c2_i32_1 = arith.constant 2 : i32
    %6 = arith.subi %c2_i32_1, %5 : i32
    %c0 = arith.constant 0 : index
    %c0_2 = arith.constant 0 : index
    %c0_3 = arith.constant 0 : index
    %7 = vector.load %arg2[%c0, %c0_2, %c0_3] : memref<2x2x128xf32, #tpu.memory_space<vmem>>, vector<2x2x128xf32>
    %c0_4 = arith.constant 0 : index
    %c0_5 = arith.constant 0 : index
    %c0_6 = arith.constant 0 : index
    %8 = vector.load %arg3[%c0_4, %c0_5, %c0_6] : memref<2x2x128xf32, #tpu.memory_space<vmem>>, vector<2x2x128xf32>
    %cst = arith.constant 5.000000e-01 : f32
    %9 = vector.broadcast %cst : f32 to vector<2x2x128xf32>
    %10 = arith.mulf %9, %7 : vector<2x2x128xf32>
    %11 = math.tanh %10 : vector<2x2x128xf32>
    %cst_7 = arith.constant 5.000000e-01 : f32
    %12 = vector.broadcast %cst_7 : f32 to vector<2x2x128xf32>
    %13 = arith.mulf %12, %11 : vector<2x2x128xf32>
    %cst_8 = arith.constant 5.000000e-01 : f32
    %14 = vector.broadcast %cst_8 : f32 to vector<2x2x128xf32>
    %15 = arith.addf %13, %14 : vector<2x2x128xf32>
    %c2_i32_9 = arith.constant 2 : i32
    %16 = arith.cmpi sge, %6, %c2_i32_9 : i32
    %17 = arith.extui %16 : i1 to i32
    %c0_i32_10 = arith.constant 0 : i32
    %18 = arith.cmpi ne, %17, %c0_i32_10 : i32
    scf.if %18 {
      %c0_15 = arith.constant 0 : index
      %c0_16 = arith.constant 0 : index
      %25 = vector.load %arg5[%c0_15, %c0_16] : memref<2x128xf32, #tpu.memory_space<vmem>>, vector<2x128xf32>
      %26 = arith.mulf %15, %8 : vector<2x2x128xf32>
      %cst_17 = arith.constant dense<0.000000e+00> : vector<2x128xf32>
      %27 = vector.multi_reduction <add>, %26, %cst_17 [1] : vector<2x2x128xf32> to vector<2x128xf32>
      %28 = arith.addf %25, %27 : vector<2x128xf32>
      %c0_18 = arith.constant 0 : index
      %c0_19 = arith.constant 0 : index
      %29 = vector.load %arg5[%c0_18, %c0_19] : memref<2x128xf32, #tpu.memory_space<vmem>>, vector<2x128xf32>
      tpu.vector_store %arg5[%c0_18, %c0_19], %28 {strides = array<i32>} : memref<2x128xf32, #tpu.memory_space<vmem>>, vector<2x128xf32>,
      %c0_20 = arith.constant 0 : index
      %c0_21 = arith.constant 0 : index
      %30 = vector.load %arg6[%c0_20, %c0_21] : memref<2x128xf32, #tpu.memory_space<vmem>>, vector<2x128xf32>
      %31 = arith.addf %15, %8 : vector<2x2x128xf32>
      %cst_22 = arith.constant dense<0.000000e+00> : vector<2x128xf32>
      %32 = vector.multi_reduction <add>, %31, %cst_22 [1] : vector<2x2x128xf32> to vector<2x128xf32>
      %33 = arith.addf %30, %32 : vector<2x128xf32>
      %c0_23 = arith.constant 0 : index
      %c0_24 = arith.constant 0 : index
      %34 = vector.load %arg6[%c0_23, %c0_24] : memref<2x128xf32, #tpu.memory_space<vmem>>, vector<2x128xf32>
      tpu.vector_store %arg6[%c0_23, %c0_24], %33 {strides = array<i32>} : memref<2x128xf32, #tpu.memory_space<vmem>>, vector<2x128xf32>,
    } else {
    }
    %c2_i32_11 = arith.constant 2 : i32
    %19 = arith.cmpi slt, %6, %c2_i32_11 : i32
    %20 = arith.extui %19 : i1 to i32
    %c0_i32_12 = arith.constant 0 : i32
    %21 = arith.cmpi ne, %20, %c0_i32_12 : i32
    scf.if %21 {
      %25 = tpu.iota {dimensions = array<i32: 1>} : vector<2x2x128xi32>
      %26 = vector.broadcast %6 : i32 to vector<2x2x128xi32>
      %27 = arith.cmpi slt, %25, %26 : vector<2x2x128xi32>
      %c0_15 = arith.constant 0 : index
      %c0_16 = arith.constant 0 : index
      %28 = vector.load %arg5[%c0_15, %c0_16] : memref<2x128xf32, #tpu.memory_space<vmem>>, vector<2x128xf32>
      %29 = arith.mulf %15, %8 : vector<2x2x128xf32>
      %cst_17 = arith.constant 0.000000e+00 : f32
      %30 = vector.broadcast %cst_17 : f32 to vector<2x2x128xf32>
      %31 = arith.select %27, %29, %30 : vector<2x2x128xi1>, vector<2x2x128xf32>
      %cst_18 = arith.constant dense<0.000000e+00> : vector<2x128xf32>
      %32 = vector.multi_reduction <add>, %31, %cst_18 [1] : vector<2x2x128xf32> to vector<2x128xf32>
      %33 = arith.addf %28, %32 : vector<2x128xf32>
      %c0_19 = arith.constant 0 : index
      %c0_20 = arith.constant 0 : index
      %34 = vector.load %arg5[%c0_19, %c0_20] : memref<2x128xf32, #tpu.memory_space<vmem>>, vector<2x128xf32>
      tpu.vector_store %arg5[%c0_19, %c0_20], %33 {strides = array<i32>} : memref<2x128xf32, #tpu.memory_space<vmem>>, vector<2x128xf32>,
      %c0_21 = arith.constant 0 : index
      %c0_22 = arith.constant 0 : index
      %35 = vector.load %arg6[%c0_21, %c0_22] : memref<2x128xf32, #tpu.memory_space<vmem>>, vector<2x128xf32>
      %36 = arith.addf %15, %8 : vector<2x2x128xf32>
      %cst_23 = arith.constant 0.000000e+00 : f32
      %37 = vector.broadcast %cst_23 : f32 to vector<2x2x128xf32>
      %38 = arith.select %27, %36, %37 : vector<2x2x128xi1>, vector<2x2x128xf32>
      %cst_24 = arith.constant dense<0.000000e+00> : vector<2x128xf32>
      %39 = vector.multi_reduction <add>, %38, %cst_24 [1] : vector<2x2x128xf32> to vector<2x128xf32>
      %40 = arith.addf %35, %39 : vector<2x128xf32>
      %c0_25 = arith.constant 0 : index
      %c0_26 = arith.constant 0 : index
      %41 = vector.load %arg6[%c0_25, %c0_26] : memref<2x128xf32, #tpu.memory_space<vmem>>, vector<2x128xf32>
      tpu.vector_store %arg6[%c0_25, %c0_26], %40 {strides = array<i32>} : memref<2x128xf32, #tpu.memory_space<vmem>>, vector<2x128xf32>,
    } else {
    }
    %c0_i32_13 = arith.constant 0 : i32
    %22 = arith.cmpi eq, %arg1, %c0_i32_13 : i32
    %23 = arith.extui %22 : i1 to i32
    %c0_i32_14 = arith.constant 0 : i32
    %24 = arith.cmpi ne, %23, %c0_i32_14 : i32
    scf.if %24 {
      %c0_15 = arith.constant 0 : index
      %c0_16 = arith.constant 0 : index
      %25 = vector.load %arg5[%c0_15, %c0_16] : memref<2x128xf32, #tpu.memory_space<vmem>>, vector<2x128xf32>
      %c0_17 = arith.constant 0 : index
      %c0_18 = arith.constant 0 : index
      %c0_19 = arith.constant 0 : index
      %c0_20 = arith.constant 0 : index
      %26 = vector.load %arg4[%c0_17, %c0_18, %c0_19, %c0_20] : memref<1x2x2x128xf32, #tpu.memory_space<vmem>>, vector<1x1x2x128xf32>
      %27 = vector.shape_cast %26 : vector<1x1x2x128xf32> to vector<2x128xf32>
      %28 = vector.shape_cast %25 : vector<2x128xf32> to vector<1x1x2x128xf32>
      tpu.vector_store %arg4[%c0_17, %c0_18, %c0_19, %c0_20], %28 {strides = array<i32>} : memref<1x2x2x128xf32, #tpu.memory_space<vmem>>, vector<1x1x2x128xf32>,
      %c0_21 = arith.constant 0 : index
      %c0_22 = arith.constant 0 : index
      %29 = vector.load %arg6[%c0_21, %c0_22] : memref<2x128xf32, #tpu.memory_space<vmem>>, vector<2x128xf32>
      %c0_23 = arith.constant 0 : index
      %c1 = arith.constant 1 : index
      %c0_24 = arith.constant 0 : index
      %c0_25 = arith.constant 0 : index
      %30 = vector.load %arg4[%c0_23, %c1, %c0_24, %c0_25] : memref<1x2x2x128xf32, #tpu.memory_space<vmem>>, vector<1x1x2x128xf32>
      %31 = vector.shape_cast %30 : vector<1x1x2x128xf32> to vector<2x128xf32>
      %32 = vector.shape_cast %29 : vector<2x128xf32> to vector<1x1x2x128xf32>
      tpu.vector_store %arg4[%c0_23, %c1, %c0_24, %c0_25], %32 {strides = array<i32>} : memref<1x2x2x128xf32, #tpu.memory_space<vmem>>, vector<1x1x2x128xf32>,
    } else {
    }
    return
  }
  func.func @transform_0(%arg0: i32, %arg1: i32) -> (i32, i32, i32) {
    %c1_i32 = arith.constant 1 : i32
    %0 = arith.muli %arg0, %c1_i32 : i32
    %1 = arith.addi %0, %arg1 : i32
    %c0_i32 = arith.constant 0 : i32
    %2 = arith.minsi %1, %c0_i32 : i32
    %c0_i32_0 = arith.constant 0 : i32
    %c0_i32_1 = arith.constant 0 : i32
    %c0_i32_2 = arith.constant 0 : i32
    return %c0_i32_0, %2, %c0_i32_1 : i32, i32, i32
  }
  func.func @transform_1(%arg0: i32, %arg1: i32) -> (i32, i32, i32) {
    %c1_i32 = arith.constant 1 : i32
    %0 = arith.muli %arg0, %c1_i32 : i32
    %1 = arith.addi %0, %arg1 : i32
    %c0_i32 = arith.constant 0 : i32
    %2 = arith.minsi %1, %c0_i32 : i32
    %c0_i32_0 = arith.constant 0 : i32
    %c0_i32_1 = arith.constant 0 : i32
    %c0_i32_2 = arith.constant 0 : i32
    return %c0_i32_0, %2, %c0_i32_1 : i32, i32, i32
  }
  func.func @transform_2(%arg0: i32, %arg1: i32) -> (i32, i32, i32, i32) {
    %c0_i32 = arith.constant 0 : i32
    %c0_i32_0 = arith.constant 0 : i32
    %c0_i32_1 = arith.constant 0 : i32
    %c0_i32_2 = arith.constant 0 : i32
    return %arg0, %c0_i32, %c0_i32_0, %c0_i32_1 : i32, i32, i32, i32
  }
}

</mosaic_0001>

<bundles_post_ra>
// kernel: tpu_custom_call.1
= control target key start
LH: loop header
LB: loop body
LE: loop exit
PB: predicated region body
PF: predicated region fallthrough
CT: control target
= control target key end

     0   :  { %7 = vsyncpa [#allocation5], 0  ;;  %s367_s0 = inlined_call_operand.hbm [shape: f32[2,2,128], index: 0, kind: input, shape index: {}]   ;;  %s368_s1 = inlined_call_operand.hbm [shape: f32[2,2,128], index: 1, kind: input, shape index: {}]   ;;  %s369_s2 = inlined_call_operand.hbm [shape: f32[1,2,2,128], index: 2, kind: output, shape index: {}]  }
   0x1   :  { %8 = vsyncpa [#allocation8], 0 }
   0x2   :  { %9 = vsyncpa [#allocation6], 0  ;;  %s301_s9 = smov [#allocation4]   ;;  %s229_s13 = scalar_lea.hbm %s367_s0, 64 }
   0x3   :  { %s20_s10 = sshll.u32 %s301_s9, 4  ;;  %p230_p0 = scmp.ne.s32.totalorder %s367_s0, %s229_s13  ;;  %s21_s10 = int_to_ptr.vmem [resolvable:$true] %s20_s10 }
   0x4   :  { %p233_p1 = scmp.lt.u32.totalorder %s229_s13, %s367_s0 }
   0x6   :  { %p235_p2 = pnand %p233_p1, %p230_p0 }
   0x8   :  { %238 = shalt.err (!%p235_p2)
}
   0x9   :  { %s239_s18 = scalar_lea.vmem %s21_s10, 64  ;;  %p244_p4 = scmp.lt.s32.totalorder %s21_s10, %s21_s10 }
   0xa   :  { %p240_p3 = scmp.ne.s32.totalorder %s21_s10, %s239_s18  ;;  %p245_p5 = scmp.lt.s32.totalorder %s239_s18, %s239_s18 }
   0xc   :  { %p246_p6 = por %p245_p5, %p244_p4 }
   0xe   :  { %p247_p7 = pnand %p246_p6, %p240_p3 }
  0x10   :  { %250 = shalt.err (!%p247_p7)
}
  0x11   :  { %s302_s19 = smov 32   ;;  %s303_s20 = smov 2  }
  0x12   :  { %26 = dma.hbm_to_vmem [thread:$0]  %s367_s0, 64, %s21_s10, [#allocation5], %s302_s19, %s302_s19, %s303_s20  }
  0x13   :  { %s304_s23 = smov [#allocation7]   ;;  %s251_s27 = scalar_lea.hbm %s368_s1, 64 }
  0x14   :  { %s37_s24 = sshll.u32 %s304_s23, 4  ;;  %p252_p8 = scmp.ne.s32.totalorder %s368_s1, %s251_s27  ;;  %s38_s24 = int_to_ptr.vmem [resolvable:$true] %s37_s24 }
  0x15   :  { %p255_p9 = scmp.lt.u32.totalorder %s251_s27, %s368_s1 }
  0x17   :  { %p257_p10 = pnand %p255_p9, %p252_p8 }
  0x19   :  { %260 = shalt.err (!%p257_p10)
}
  0x1a   :  { %s261_s4 = scalar_lea.vmem %s38_s24, 64  ;;  %p266_p12 = scmp.lt.s32.totalorder %s38_s24, %s38_s24 }
  0x1b   :  { %p262_p11 = scmp.ne.s32.totalorder %s38_s24, %s261_s4  ;;  %p267_p13 = scmp.lt.s32.totalorder %s261_s4, %s261_s4 }
  0x1d   :  { %p268_p0 = por %p267_p13, %p266_p12 }
  0x1f   :  { %p269_p1 = pnand %p268_p0, %p262_p11 }
  0x21   :  { %272 = shalt.err (!%p269_p1)
}
  0x22   :  { %43 = dma.hbm_to_vmem [thread:$0]  %s368_s1, 64, %s38_s24, [#allocation8], %s302_s19, %s302_s19, %s303_s20  }
  0x23   :  { %295 = dma.done.wait [#allocation5], 64  }
  0x24   :  { %296 = vsyncadd [#allocation5], 4294967232 }
  0x25   :  { %297 = dma.done.wait [#allocation8], 64  }
  0x26   :  { %298 = vsyncadd [#allocation8], 4294967232  ;;  %v305_v0 = vmov 0.0   ;;  %v65_v1 = vld [vmem:[#allocation4] sm:$0x3]  ;;  %vm84_vm0 = vcmask 1041408  }
  0x27   :  { %60 = vst [vmem:[#allocation2] sm:$0x3] %v305_v0  ;;  %61 = vst [vmem:[#allocation3] sm:$0x3] %v305_v0  ;;  %v66_v2 = vld [vmem:[#allocation4 + $0x2] sm:$0x3] }
  0x28   :  { %v69_v3 = vmul.f32 0.5, %v65_v1  ;;  %v70_v4 = vmul.f32 0.5, %v66_v2  ;;  %v67_v8 = vld [vmem:[#allocation7] sm:$0x3]  ;;  %v68_v10 = vld [vmem:[#allocation7 + $0x2] sm:$0x3] }
  0x29   :  { %vm101_vm1 = vcmask 1041409   ;;  %s306_s1 = smov [#allocation9]  }
  0x2a   :  { %225 = vtanh.f32 %v69_v3  ;;  %s202_s6 = sshll.u32 %s306_s1, 4  ;;  %s203_s6 = int_to_ptr.vmem [resolvable:$true] %s202_s6 }
  0x2b   :  { %227 = vtanh.f32 %v70_v4  ;;  %s273_s7 = scalar_lea.vmem %s203_s6, 64  ;;  %p278_p3 = scmp.lt.s32.totalorder %s203_s6, %s203_s6 }
  0x2c   :  { %p274_p2 = scmp.ne.s32.totalorder %s203_s6, %s273_s7  ;;  %p279_p4 = scmp.lt.s32.totalorder %s273_s7, %s273_s7 }
  0x2e   :  { %v81_v43 = vld [vmem:[#allocation2] sm:$0x3]  ;;  %v106_v45 = vld [vmem:[#allocation3] sm:$0x3]  ;;  %p280_p5 = por %p279_p4, %p278_p3 }
  0x30   :  { %p281_p6 = pnand %p280_p5, %p274_p2 }
  0x34   :  { %v226_v5 = vpop.eup %225 }
  0x35   :  { %v228_v6 = vpop.eup %227  ;;  %v73_v7 = vmul.f32 0.5, %v226_v5 }
  0x36   :  { %v74_v9 = vmul.f32 0.5, %v228_v6 }
  0x37   :  { %v75_v11 = vadd.f32 0.5, %v73_v7 }
  0x38   :  { %v76_v12 = vadd.f32 0.5, %v74_v9 }
  0x39   :  { %v82_v13 = vmul.f32 %v75_v11, %v67_v8  ;;  %v107_v14 = vadd.f32 %v75_v11, %v67_v8 }
  0x3a   :  { %v83_v15 = vmul.f32 %v76_v12, %v68_v10  ;;  %v108_v16 = vadd.f32 %v76_v12, %v68_v10 }
  0x3b   :  { %v85_v17 = vsel %vm84_vm0, %v82_v13, 0.0  ;;  %v109_v18 = vsel %vm84_vm0, %v107_v14, 0.0 }
  0x3c   :  { %v86_v19 = vrot.slane %v85_v17, 4  ;;  %v92_v20 = vsel %vm84_vm0, %v83_v15, 0.0  ;;  %v110_v21 = vrot.slane %v109_v18, 4  ;;  %v116_v22 = vsel %vm84_vm0, %v108_v16, 0.0 }
  0x3d   :  { %v93_v23 = vrot.slane %v92_v20, 4  ;;  %v117_v24 = vrot.slane %v116_v22, 4 }
  0x3e   :  { %v87_v25 = vadd.f32 %v86_v19, %v85_v17  ;;  %v111_v26 = vadd.f32 %v110_v21, %v109_v18 }
  0x3f   :  { %v94_v27 = vadd.f32 %v93_v23, %v92_v20  ;;  %v118_v28 = vadd.f32 %v117_v24, %v116_v22 }
  0x40   :  { %v88_v29 = vrot.slane %v87_v25, 2  ;;  %v112_v30 = vrot.slane %v111_v26, 2 }
  0x41   :  { %v95_v31 = vrot.slane %v94_v27, 2  ;;  %v119_v32 = vrot.slane %v118_v28, 2 }
  0x42   :  { %v89_v33 = vadd.f32 %v88_v29, %v87_v25  ;;  %v113_v34 = vadd.f32 %v112_v30, %v111_v26 }
  0x43   :  { %v96_v35 = vadd.f32 %v95_v31, %v94_v27  ;;  %v120_v36 = vadd.f32 %v119_v32, %v118_v28 }
  0x44   :  { %v90_v37 = vrot.slane %v89_v33, 1  ;;  %v114_v38 = vrot.slane %v113_v34, 1 }
  0x45   :  { %v97_v39 = vrot.slane %v96_v35, 1  ;;  %v121_v40 = vrot.slane %v120_v36, 1 }
  0x46   :  { %v91_v41 = vadd.f32 %v90_v37, %v89_v33  ;;  %v115_v42 = vadd.f32 %v114_v38, %v113_v34 }
  0x47   :  { %v98_v44 = vadd.f32 %v97_v39, %v96_v35  ;;  %v122_v46 = vadd.f32 %v121_v40, %v120_v36 }
  0x49   :  { %v102_v47 = vsel %vm101_vm1, %v98_v44, %v91_v41  ;;  %v125_v48 = vsel %vm101_vm1, %v122_v46, %v115_v42 }
  0x4a   :  { %v104_v49 = vadd.f32 %v102_v47, %v81_v43  ;;  %v127_v50 = vadd.f32 %v125_v48, %v106_v45 }
  0x4c   :  { %105 = vst [vmem:[#allocation2] sm:$0x3] %v104_v49  ;;  %128 = vst [vmem:[#allocation3] sm:$0x3] %v127_v50 }
  0x53   :  { %v192_v51 = vld [vmem:[#allocation2] sm:$0x3]  ;;  %v194_v52 = vld [vmem:[#allocation3] sm:$0x3] }
  0x54   :  { %193 = vst [vmem:[#allocation9] sm:$0x3] %v192_v51  ;;  %196 = vst [vmem:[#allocation9 + $0x2] sm:$0x3] %v194_v52 }
  0x55   :  { %284 = shalt.err (!%p281_p6)
}
  0x56   :  { %s285_s10 = scalar_lea.hbm %s369_s2, 64 }
  0x57   :  { %p286_p7 = scmp.ne.s32.totalorder %s369_s2, %s285_s10  ;;  %p289_p8 = scmp.lt.u32.totalorder %s285_s10, %s369_s2 }
  0x59   :  { %p291_p9 = pnand %p289_p8, %p286_p7 }
  0x5b   :  { %294 = shalt.err (!%p291_p9)
}
  0x5c   :  { %208 = dma.vmem_to_hbm [thread:$0]  %s203_s6, 64, %s369_s2, [#allocation6], %s302_s19, %s302_s19, %s303_s20  }
  0x5d   :  { %299 = dma.done.wait [#allocation6], 64  }
  0x5e   :  { %300 = vsyncadd [#allocation6], 4294967232 }
  0x5f   :  { %212 = vsyncpa [#allocation5], 1 }
  0x60   :  { %213 = vsyncpa [#allocation8], 1 }
  0x61   :  { %214 = vsyncpa [#allocation6], 1 }

</bundles_post_ra>
